<compile_context>
chip_gen: v5e
topology: v5e:2x2
jax: 0.10.0
libtpu: 0.0.40
codegen_flags: <defaults>
</compile_context>

<pallas_src>
import functools

import jax
import jax.numpy as jnp
from jax.experimental import pallas as pl
from jax.experimental.pallas import tpu as pltpu


_LANE = 128  # TPU lane width; every padded feature dim is a multiple of this.


# ---------------------------------------------------------------- kernel ----
def _gcn_deep_sigmoid_kernel(x_ref, adj_ref, w_ref, b_ref, out_ref, *, n_layers):
    """Fused forward: L x (adj @ (h @ W_i) + b_i), ReLU between, sigmoid at end.

    x_ref   : [N, P]      bf16  (features zero-padded to P = 128)
    adj_ref : [N, N]      bf16  (dense normalized adjacency)
    w_ref   : [L, P, P]   bf16  (all layer weights, zero-padded + stacked)
    b_ref   : [L, P]      f32   (all layer biases,  zero-padded + stacked)
    out_ref : [N, P]      f32   (lane-dense; real outputs in the first nout cols)
    """
    adj = adj_ref[...]          # bf16 [N, N]
    h = x_ref[...]              # bf16 [N, P]

    # TODO(synk): F.dropout omitted (eval mode => identity).  Training-mode
    # dropout would need pltpu.prng_seed / pltpu.prng_random_bits.
    #
    # NOTE: static unroll is fine for the shallow stacks this module uses; for
    # deep stacks switch to lax.fori_loop(..., unroll=True) over w_ref[i] to
    # bound live ranges.
    for i in range(n_layers):
        # support = h @ W_i         (MXU: bf16 operands, f32 accumulation)
        s = jnp.dot(h, w_ref[i], preferred_element_type=jnp.float32)
        # z = adj @ support + b_i   (elementwise math stays f32; bf16 only at MXU)
        z = jnp.dot(adj, s.astype(jnp.bfloat16),
                    preferred_element_type=jnp.float32)
        z = z + b_ref[i:i + 1, :]
        if i < n_layers - 1:
            # ReLU in f32, cast to bf16 only as the next matmul operand.
            h = jnp.maximum(z, 0.0).astype(jnp.bfloat16)
        else:
            # sigmoid(z) = 1 / (1 + exp(-z)): exp and approximate reciprocal
            # both land in the EUP slot.
            out_ref[...] = pl.reciprocal(1.0 + jnp.exp(-z), approx=True)


# --------------------------------------------------------------- wrapper ----
_VMEM = pl.BlockSpec(memory_space=pltpu.MemorySpace.VMEM)


def _vmem_budget_bytes(n, pad, n_layers):
    """Resident-set estimate (+headroom) for the gridless fused kernel."""
    resident = (
        n * n * 2                       # adj (bf16)
        + n * pad * 2                   # x (bf16)
        + n_layers * pad * pad * 2      # stacked weights (bf16)
        + n_layers * pad * 4            # stacked biases (f32)
        + n * pad * 4                   # output (f32)
        + 4 * n * pad * 4               # f32 intermediates (s, z, h, ...)
    )
    return int(min(max(2 * resident, 16 * 1024 * 1024), 64 * 1024 * 1024))


def gcn_deep_sigmoid_forward(x, adj, packed, nout):
    """Fused forward pass. Returns the flattened per-node probabilities [N*nout]."""
    n, nfeat = x.shape
    w_all = packed["w"]          # [L, P, P] bf16
    b_all = packed["b"]          # [L, P]    f32
    n_layers, pad, _ = w_all.shape

    # Zero-pad the input features to the lane width and cast the two matmul
    # operands that live in HBM (x, adj) to bf16 once, host side.
    x_p = jnp.zeros((n, pad), jnp.bfloat16).at[:, :nfeat].set(
        x.astype(jnp.bfloat16))
    adj_bf = adj.astype(jnp.bfloat16)

    kern = functools.partial(_gcn_deep_sigmoid_kernel, n_layers=n_layers)
    out2d = pl.pallas_call(
        kern,
        out_shape=jax.ShapeDtypeStruct((n, pad), jnp.float32),
        in_specs=[_VMEM] * 4,
        out_specs=_VMEM,
        compiler_params=pltpu.CompilerParams(
            vmem_limit_bytes=_vmem_budget_bytes(n, pad, n_layers)),
    )(x_p, adj_bf, w_all, b_all)

    # torch.nn.Sigmoid()(x).flatten(): drop the zero-padded columns, flatten.
    return out2d[:, :nout].reshape(-1)


# ----------------------------------------------------------------- params ---
def init_params(key, nfeat, nhid, nout, nlayers):
    """PyTorch GraphConvolution init: uniform(-1/sqrt(fan_out), 1/sqrt(fan_out)).

    Returns an (unpadded, f32) list of (W, b) per layer:
      layer 0        : [nfeat, nhid]
      layers 1..L-2  : [nhid,  nhid]
      layer L-1      : [nhid,  nout]
    """
    assert nlayers >= 2, "need at least gcstart + gcend"
    dims = [nfeat] + [nhid] * (nlayers - 1) + [nout]
    ks = jax.random.split(key, 2 * nlayers)

    layers = []
    for i in range(nlayers):
        fan_in, fan_out = dims[i], dims[i + 1]
        stdv = 1.0 / jnp.sqrt(jnp.float32(fan_out))
        w = jax.random.uniform(ks[2 * i], (fan_in, fan_out), jnp.float32,
                               -stdv, stdv)
        b = jax.random.uniform(ks[2 * i + 1], (fan_out,), jnp.float32,
                               -stdv, stdv)
        layers.append((w, b))
    return layers


def pack_params(layers, lane=_LANE):
    """Zero-pad every layer to [lane, lane] / [lane], cast W to bf16, stack.

    Zero padding is exact: padded input columns are zero and padded weight
    rows/cols are zero, so padded channels carry zeros through every layer and
    are sliced off after the kernel.
    """
    n_layers = len(layers)
    w_all = jnp.zeros((n_layers, lane, lane), jnp.float32)
    b_all = jnp.zeros((n_layers, lane), jnp.float32)
    for i, (w, b) in enumerate(layers):
        fin, fout = w.shape
        assert fin <= lane and fout <= lane, "pad width must cover all dims"
        w_all = w_all.at[i, :fin, :fout].set(w)
        b_all = b_all.at[i, :fout].set(b)
    return {"w": w_all.astype(jnp.bfloat16), "b": b_all}


# ------------------------------------------------------------ pure-JAX ref --
def _reference_forward(x, adj, layers):
    h = x
    for i, (w, b) in enumerate(layers):
        z = adj @ (h @ w) + b[None, :]
        h = jax.nn.relu(z) if i < len(layers) - 1 else jax.nn.sigmoid(z)
    return h.reshape(-1)


# ------------------------------------------------------------------- main ---
if __name__ == "__main__":
    N, nfeat, nhid, nout, nlayers = 16, 8, 32, 1, 4

    key = jax.random.PRNGKey(0)
    kx, kadj, kp = jax.random.split(key, 3)

    x = jax.random.normal(kx, (N, nfeat), jnp.float32)

    # Symmetric adjacency with self-loops, symmetrically normalized (the usual
    # preprocessed `adj` a GCN consumes).
    a = (jax.random.uniform(kadj, (N, N)) < 0.3).astype(jnp.float32)
    a = jnp.clip(a + a.T, 0.0, 1.0) * (1.0 - jnp.eye(N, dtype=jnp.float32))
    a = a + jnp.eye(N, dtype=jnp.float32)
    deg = jnp.sum(a, axis=1)
    d_inv_sqrt = 1.0 / jnp.sqrt(deg)
    adj = a * d_inv_sqrt[:, None] * d_inv_sqrt[None, :]

    layers = init_params(kp, nfeat, nhid, nout, nlayers)
    packed = pack_params(layers)

    out = gcn_deep_sigmoid_forward(x, adj, packed, nout)
    jax.block_until_ready(out)

    assert out.shape == (N * nout,)
    assert bool(jnp.all(jnp.isfinite(out)))
    # sigmoid range (allow a hair of slack for the approximate reciprocal).
    assert bool(jnp.all((out >= 0.0) & (out <= 1.0 + 1e-3)))

    # Cross-check against a pure-JAX f32 reference (bf16 matmuls drift a bit).
    ref = _reference_forward(x, adj, layers)
    assert bool(jnp.max(jnp.abs(out - ref)) < 3e-2), (
        f"max abs diff {float(jnp.max(jnp.abs(out - ref))):.4f}")

    print("KERNEL_OK")
</pallas_src>

<mosaic_0001>
module attributes {stable_mosaic.version = 11 : i64} {
  func.func @_gcn_deep_sigmoid_kernel(%arg0: memref<16x128xbf16, #tpu.memory_space<vmem>>, %arg1: memref<16x16xbf16, #tpu.memory_space<vmem>>, %arg2: memref<4x128x128xbf16, #tpu.memory_space<vmem>>, %arg3: memref<4x128xf32, #tpu.memory_space<vmem>>, %arg4: memref<16x128xf32, #tpu.memory_space<vmem>>) attributes {dimension_semantics = [], scalar_prefetch = 0 : i64, scratch_operands = 0 : i64, tpu.core_type = #tpu.core_type<tc>} {
    %c0 = arith.constant 0 : index
    %c0_0 = arith.constant 0 : index
    %0 = vector.load %arg1[%c0, %c0_0] : memref<16x16xbf16, #tpu.memory_space<vmem>>, vector<16x16xbf16>
    %c0_1 = arith.constant 0 : index
    %c0_2 = arith.constant 0 : index
    %1 = vector.load %arg0[%c0_1, %c0_2] : memref<16x128xbf16, #tpu.memory_space<vmem>>, vector<16x128xbf16>
    %c0_3 = arith.constant 0 : index
    %c0_4 = arith.constant 0 : index
    %c0_5 = arith.constant 0 : index
    %2 = vector.load %arg2[%c0_3, %c0_4, %c0_5] : memref<4x128x128xbf16, #tpu.memory_space<vmem>>, vector<1x128x128xbf16>
    %3 = vector.shape_cast %2 : vector<1x128x128xbf16> to vector<128x128xbf16>
    %cst = arith.constant dense<0.000000e+00> : vector<16x128xf32>
    %4 = tpu.matmul %1, %3, %cst {dimension_numbers = #tpu.dot_dimension_numbers<[1], [0], [0], [1], [0, 0, 1, 1], [], []>} : vector<16x128xbf16>, vector<128x128xbf16>, vector<16x128xf32> -> vector<16x128xf32>
    %5 = arith.truncf %4 : vector<16x128xf32> to vector<16x128xbf16>
    %cst_6 = arith.constant dense<0.000000e+00> : vector<16x128xf32>
    %6 = tpu.matmul %0, %5, %cst_6 {dimension_numbers = #tpu.dot_dimension_numbers<[1], [0], [0], [1], [0, 0, 1, 1], [], []>} : vector<16x16xbf16>, vector<16x128xbf16>, vector<16x128xf32> -> vector<16x128xf32>
    %c0_7 = arith.constant 0 : index
    %c0_8 = arith.constant 0 : index
    %7 = vector.load %arg3[%c0_7, %c0_8] : memref<4x128xf32, #tpu.memory_space<vmem>>, vector<1x128xf32>
    %8 = vector.broadcast %7 : vector<1x128xf32> to vector<16x128xf32>
    %9 = arith.addf %6, %8 : vector<16x128xf32>
    %cst_9 = arith.constant 0.000000e+00 : f32
    %10 = vector.broadcast %cst_9 : f32 to vector<16x128xf32>
    %11 = arith.maximumf %9, %10 : vector<16x128xf32>
    %12 = arith.truncf %11 : vector<16x128xf32> to vector<16x128xbf16>
    %c1 = arith.constant 1 : index
    %c0_10 = arith.constant 0 : index
    %c0_11 = arith.constant 0 : index
    %13 = vector.load %arg2[%c1, %c0_10, %c0_11] : memref<4x128x128xbf16, #tpu.memory_space<vmem>>, vector<1x128x128xbf16>
    %14 = vector.shape_cast %13 : vector<1x128x128xbf16> to vector<128x128xbf16>
    %cst_12 = arith.constant dense<0.000000e+00> : vector<16x128xf32>
    %15 = tpu.matmul %12, %14, %cst_12 {dimension_numbers = #tpu.dot_dimension_numbers<[1], [0], [0], [1], [0, 0, 1, 1], [], []>} : vector<16x128xbf16>, vector<128x128xbf16>, vector<16x128xf32> -> vector<16x128xf32>
    %16 = arith.truncf %15 : vector<16x128xf32> to vector<16x128xbf16>
    %cst_13 = arith.constant dense<0.000000e+00> : vector<16x128xf32>
    %17 = tpu.matmul %0, %16, %cst_13 {dimension_numbers = #tpu.dot_dimension_numbers<[1], [0], [0], [1], [0, 0, 1, 1], [], []>} : vector<16x16xbf16>, vector<16x128xbf16>, vector<16x128xf32> -> vector<16x128xf32>
    %c1_14 = arith.constant 1 : index
    %c0_15 = arith.constant 0 : index
    %18 = vector.load %arg3[%c1_14, %c0_15] : memref<4x128xf32, #tpu.memory_space<vmem>>, vector<1x128xf32>
    %19 = vector.broadcast %18 : vector<1x128xf32> to vector<16x128xf32>
    %20 = arith.addf %17, %19 : vector<16x128xf32>
    %cst_16 = arith.constant 0.000000e+00 : f32
    %21 = vector.broadcast %cst_16 : f32 to vector<16x128xf32>
    %22 = arith.maximumf %20, %21 : vector<16x128xf32>
    %23 = arith.truncf %22 : vector<16x128xf32> to vector<16x128xbf16>
    %c2 = arith.constant 2 : index
    %c0_17 = arith.constant 0 : index
    %c0_18 = arith.constant 0 : index
    %24 = vector.load %arg2[%c2, %c0_17, %c0_18] : memref<4x128x128xbf16, #tpu.memory_space<vmem>>, vector<1x128x128xbf16>
    %25 = vector.shape_cast %24 : vector<1x128x128xbf16> to vector<128x128xbf16>
    %cst_19 = arith.constant dense<0.000000e+00> : vector<16x128xf32>
    %26 = tpu.matmul %23, %25, %cst_19 {dimension_numbers = #tpu.dot_dimension_numbers<[1], [0], [0], [1], [0, 0, 1, 1], [], []>} : vector<16x128xbf16>, vector<128x128xbf16>, vector<16x128xf32> -> vector<16x128xf32>
    %27 = arith.truncf %26 : vector<16x128xf32> to vector<16x128xbf16>
    %cst_20 = arith.constant dense<0.000000e+00> : vector<16x128xf32>
    %28 = tpu.matmul %0, %27, %cst_20 {dimension_numbers = #tpu.dot_dimension_numbers<[1], [0], [0], [1], [0, 0, 1, 1], [], []>} : vector<16x16xbf16>, vector<16x128xbf16>, vector<16x128xf32> -> vector<16x128xf32>
    %c2_21 = arith.constant 2 : index
    %c0_22 = arith.constant 0 : index
    %29 = vector.load %arg3[%c2_21, %c0_22] : memref<4x128xf32, #tpu.memory_space<vmem>>, vector<1x128xf32>
    %30 = vector.broadcast %29 : vector<1x128xf32> to vector<16x128xf32>
    %31 = arith.addf %28, %30 : vector<16x128xf32>
    %cst_23 = arith.constant 0.000000e+00 : f32
    %32 = vector.broadcast %cst_23 : f32 to vector<16x128xf32>
    %33 = arith.maximumf %31, %32 : vector<16x128xf32>
    %34 = arith.truncf %33 : vector<16x128xf32> to vector<16x128xbf16>
    %c3 = arith.constant 3 : index
    %c0_24 = arith.constant 0 : index
    %c0_25 = arith.constant 0 : index
    %35 = vector.load %arg2[%c3, %c0_24, %c0_25] : memref<4x128x128xbf16, #tpu.memory_space<vmem>>, vector<1x128x128xbf16>
    %36 = vector.shape_cast %35 : vector<1x128x128xbf16> to vector<128x128xbf16>
    %cst_26 = arith.constant dense<0.000000e+00> : vector<16x128xf32>
    %37 = tpu.matmul %34, %36, %cst_26 {dimension_numbers = #tpu.dot_dimension_numbers<[1], [0], [0], [1], [0, 0, 1, 1], [], []>} : vector<16x128xbf16>, vector<128x128xbf16>, vector<16x128xf32> -> vector<16x128xf32>
    %38 = arith.truncf %37 : vector<16x128xf32> to vector<16x128xbf16>
    %cst_27 = arith.constant dense<0.000000e+00> : vector<16x128xf32>
    %39 = tpu.matmul %0, %38, %cst_27 {dimension_numbers = #tpu.dot_dimension_numbers<[1], [0], [0], [1], [0, 0, 1, 1], [], []>} : vector<16x16xbf16>, vector<16x128xbf16>, vector<16x128xf32> -> vector<16x128xf32>
    %c3_28 = arith.constant 3 : index
    %c0_29 = arith.constant 0 : index
    %40 = vector.load %arg3[%c3_28, %c0_29] : memref<4x128xf32, #tpu.memory_space<vmem>>, vector<1x128xf32>
    %41 = vector.broadcast %40 : vector<1x128xf32> to vector<16x128xf32>
    %42 = arith.addf %39, %41 : vector<16x128xf32>
    %cst_30 = arith.constant 0.000000e+00 : f32
    %43 = vector.broadcast %cst_30 : f32 to vector<16x128xf32>
    %44 = arith.subf %43, %42 : vector<16x128xf32>
    %45 = math.exp %44 : vector<16x128xf32>
    %cst_31 = arith.constant 1.000000e+00 : f32
    %46 = vector.broadcast %cst_31 : f32 to vector<16x128xf32>
    %47 = arith.addf %46, %45 : vector<16x128xf32>
    %48 = tpu.reciprocal %47 {approx = true} : vector<16x128xf32> -> vector<16x128xf32>
    %c0_32 = arith.constant 0 : index
    %c0_33 = arith.constant 0 : index
    %49 = vector.load %arg4[%c0_32, %c0_33] : memref<16x128xf32, #tpu.memory_space<vmem>>, vector<16x128xf32>
    tpu.vector_store %arg4[%c0_32, %c0_33], %48 {strides = array<i32>} : memref<16x128xf32, #tpu.memory_space<vmem>>, vector<16x128xf32>,
    return
  }
}

</mosaic_0001>

<bundles_post_ra>
// kernel: tpu_custom_call.1
= control target key start
LH: loop header
LB: loop body
LE: loop exit
PB: predicated region body
PF: predicated region fallthrough
CT: control target
= control target key end

     0   :  { %9 = vsyncpa [#allocation3], 0  ;;  %s906_s0 = inlined_call_operand.hbm [shape: bf16[16,128], index: 0, kind: input, shape index: {}]   ;;  %s907_s1 = inlined_call_operand.hbm [shape: bf16[16,16], index: 1, kind: input, shape index: {}]   ;;  %s908_s2 = inlined_call_operand.hbm [shape: bf16[4,128,128], index: 2, kind: input, shape index: {}]   ;;  %s909_s3 = inlined_call_operand.hbm [shape: f32[4,128], index: 3, kind: input, shape index: {}]   ;;  %s910_s4 = inlined_call_operand.hbm [shape: f32[16,128], index: 4, kind: output, shape index: {}]  }
   0x1   :  { %10 = vsyncpa [#allocation6], 0 }
   0x2   :  { %11 = vsyncpa [#allocation9], 0 }
   0x3   :  { %12 = vsyncpa [#allocation4], 0  ;;  %s30_s17 = sshll.u32 %s907_s1, 4  ;;  %s847_s18 = smov [#allocation5]   ;;  %s31_s17 = int_to_ptr.hbm [resolvable:$true] %s30_s17 }
   0x4   :  { %s32_s19 = sshll.u32 %s847_s18, 4  ;;  %s17_s22 = sshll.u32 %s906_s0, 4  ;;  %s33_s19 = int_to_ptr.vmem [resolvable:$true] %s32_s19  ;;  %s18_s22 = int_to_ptr.hbm [resolvable:$true] %s17_s22 }
   0x5   :  { %s848_s23 = smov 64   ;;  %s849_s24 = smov 4  }
   0x6   :  { %38 = dma.hbm_to_vmem [thread:$0]  %s31_s17, 128, %s33_s19, [#allocation6], %s848_s23, %s848_s23, %s849_s24  }
   0x7   :  { %s850_s25 = smov [#allocation2]   ;;  %s43_s29 = sshll.u32 %s908_s2, 4  ;;  %s44_s29 = int_to_ptr.hbm [resolvable:$true] %s43_s29 }
   0x8   :  { %s19_s26 = sshll.u32 %s850_s25, 4  ;;  %s57_s5 = sshll.u32 %s909_s3, 4  ;;  %s20_s26 = int_to_ptr.vmem [resolvable:$true] %s19_s26  ;;  %s58_s5 = int_to_ptr.hbm [resolvable:$true] %s57_s5 }
   0x9   :  { %25 = dma.hbm_to_vmem [thread:$0]  %s18_s22, 128, %s20_s26, [#allocation3], %s848_s23, %s848_s23, %s849_s24  }
   0xa   :  { %s851_s6 = smov [#allocation7]   ;;  %s852_s0 = smov [#allocation8]  }
   0xb   :  { %s45_s7 = sshll.u32 %s851_s6, 4  ;;  %s59_s8 = sshll.u32 %s852_s0, 4  ;;  %s46_s7 = int_to_ptr.vmem [resolvable:$true] %s45_s7  ;;  %s60_s8 = int_to_ptr.vmem [resolvable:$true] %s59_s8 }
   0xc   :  { %51 = dma.hbm_to_vmem [thread:$0]  %s44_s29, 4096, %s46_s7, [#allocation6], %s848_s23, %s848_s23, %s849_s24  }
   0xd   :  { %62 = dma.hbm_to_vmem [thread:$0]  %s58_s5, 64, %s60_s8, [#allocation9]  }
   0xe   :  { %839 = dma.done.wait [#allocation3], 128  }
   0xf   :  { %840 = vsyncadd [#allocation3], 4294967168 }
  0x10   :  { %841 = dma.done.wait [#allocation6], 4224  }
  0x11   :  { %842 = vsyncadd [#allocation6], 4294963072 }
  0x12   :  { %843 = dma.done.wait [#allocation9], 64  }
  0x13   :  { %844 = vsyncadd [#allocation9], 4294967232  ;;  %v673_v0 = vld [vmem:[#allocation7 + $0x38] sm:$0xff]  ;;  %v672_v1 = vld [vmem:[#allocation7 + $0x30] sm:$0xff]  ;;  %vm176_vm0 = vcmask 130048   ;;  %s853_s2 = smov [#allocation10]  }
  0x14   :  { %154 = vmatpush.bf16.msra.mxu0 %v673_v0  ;;  %v671_v2 = vld [vmem:[#allocation7 + $0x28] sm:$0xff]  ;;  %v670_v3 = vld [vmem:[#allocation7 + $0x20] sm:$0xff]  ;;  %v669_v4 = vld [vmem:[#allocation7 + $0x18] sm:$0xff]  ;;  %s507_s3 = sshll.u32 %s853_s2, 4  ;;  %s509_s11 = sshll.u32 %s910_s4, 4  ;;  %s508_s3 = int_to_ptr.vmem [resolvable:$true] %s507_s3  ;;  %s510_s11 = int_to_ptr.hbm [resolvable:$true] %s509_s11 }
  0x15   :  { %v668_v5 = vld [vmem:[#allocation7 + $0x10] sm:$0xff]  ;;  %v667_v6 = vld [vmem:[#allocation7 + $0x8] sm:$0xff]  ;;  %v666_v7 = vld [vmem:[#allocation7] sm:$0xff]  ;;  %s854_s12 = smov 128   ;;  %s855_s13 = smov 8  }
  0x16   :  { %v665_v8 = vld [vmem:[#allocation2] sm:$0xff]  ;;  %v681_v9 = vld [vmem:[#allocation7 + $0x78] sm:$0xff]  ;;  %v679_v11 = vld [vmem:[#allocation7 + $0x68] sm:$0xff] }
  0x17   :  { %262 = vmatpush.bf16.msra.mxu2 %v681_v9  ;;  %v680_v10 = vld [vmem:[#allocation7 + $0x70] sm:$0xff]  ;;  %v678_v12 = vld [vmem:[#allocation7 + $0x60] sm:$0xff]  ;;  %v893_v16 = vld [vmem:[#allocation5] sm:$0xff] }
  0x18   :  { %155 = vmatpush.bf16.msra.mxu0 %v672_v1  ;;  %v677_v17 = vld [vmem:[#allocation7 + $0x58] sm:$0xff]  ;;  %v676_v18 = vld [vmem:[#allocation7 + $0x50] sm:$0xff]  ;;  %v675_v19 = vld [vmem:[#allocation7 + $0x48] sm:$0xff] }
  0x19   :  { %v674_v20 = vld [vmem:[#allocation7 + $0x40] sm:$0xff]  ;;  %v689_v29 = vld [vmem:[#allocation7 + $0xb8] sm:$0xff]  ;;  %v688_v30 = vld [vmem:[#allocation7 + $0xb0] sm:$0xff] }
  0x1a   :  { %v707_v22 = vld [vmem:[#allocation8] ss:$0 sm:$0xff]  ;;  %v687_v31 = vld [vmem:[#allocation7 + $0xa8] sm:$0xff]  ;;  %v685_v36 = vld [vmem:[#allocation7 + $0x98] sm:$0xff] }
  0x1b   :  { %263 = vmatpush.bf16.msra.mxu2 %v680_v10  ;;  %v686_v32 = vld [vmem:[#allocation7 + $0xa0] sm:$0xff]  ;;  %v684_v37 = vld [vmem:[#allocation7 + $0x90] sm:$0xff]  ;;  %v683_v38 = vld [vmem:[#allocation7 + $0x88] sm:$0xff] }
  0x1c   :  { %156 = vmatpush.bf16.msra.mxu0 %v671_v2  ;;  %v682_v39 = vld [vmem:[#allocation7 + $0x80] sm:$0xff]  ;;  %v697_v50 = vld [vmem:[#allocation7 + $0xf8] sm:$0xff]  ;;  %v696_v52 = vld [vmem:[#allocation7 + $0xf0] sm:$0xff] }
  0x1d   :  { %v708_v41 = vld [vmem:[#allocation8 + $0x1] ss:$0 sm:$0xff]  ;;  %v695_v53 = vld [vmem:[#allocation7 + $0xe8] sm:$0xff]  ;;  %v693_v55 = vld [vmem:[#allocation7 + $0xd8] sm:$0xff] }
  0x1e   :  { %v694_v54 = vld [vmem:[#allocation7 + $0xe0] sm:$0xff]  ;;  %v692_v56 = vld [vmem:[#allocation7 + $0xd0] sm:$0xff]  ;;  %v691_v57 = vld [vmem:[#allocation7 + $0xc8] sm:$0xff] }
  0x1f   :  { %264 = vmatpush.bf16.msra.mxu2 %v679_v11  ;;  %v690_v58 = vld [vmem:[#allocation7 + $0xc0] sm:$0xff] }
  0x20   :  { %157 = vmatpush.bf16.msra.mxu0 %v670_v3  ;;  %v709_v60 = vld [vmem:[#allocation8 + $0x2] ss:$0 sm:$0xff] }
  0x23   :  { %265 = vmatpush.bf16.msra.mxu2 %v678_v12 }
  0x24   :  { %158 = vmatpush.bf16.msra.mxu0 %v669_v4 }
  0x27   :  { %266 = vmatpush.bf16.msra.mxu2 %v677_v17 }
  0x28   :  { %159 = vmatpush.bf16.msra.mxu0 %v668_v5 }
  0x2b   :  { %267 = vmatpush.bf16.msra.mxu2 %v676_v18 }
  0x2c   :  { %160 = vmatpush.bf16.msra.mxu0 %v667_v6  ;;  %v710_v6 = vld [vmem:[#allocation8 + $0x3] ss:$0 sm:$0xff] }
  0x2f   :  { %268 = vmatpush.bf16.msra.mxu2 %v675_v19 }
  0x30   :  { %161 = vmatpush.bf16.msra.mxu0 %v666_v7 }
  0x33   :  { %162 = vmatmul.bf16.vlgmr.msra.gmra.mxu0 %v665_v8  ;;  %269 = vmatpush.bf16.msra.mxu2 %v674_v20 }
  0xb0   :  { %v163_v13 = vpop.f32.mrf.mxu0 }
  0xb8   :  { %v165_v14 = vpop.f32.mrf.mxu0 }
  0xb9   :  { %v168_v15 = vpack.c.bf16 %v165_v14, %v163_v13 }
  0xbb   :  { %187 = vmatpush.bf16.msra.mxu1 %v168_v15 }
  0xbe   :  { %564 = vmatmul.msk.bf16.vlgmr.msra.gmra.mxu1 %vm176_vm0, %v893_v16 }
  0xbf   :  { %361 = vmatpush.bf16.msrb.mxu1 %v689_v29 }
  0xc3   :  { %362 = vmatpush.bf16.msrb.mxu1 %v688_v30 }
  0xc7   :  { %363 = vmatpush.bf16.msrb.mxu1 %v687_v31 }
  0xcb   :  { %364 = vmatpush.bf16.msrb.mxu1 %v686_v32 }
  0xcf   :  { %365 = vmatpush.bf16.msrb.mxu1 %v685_v36 }
  0xd3   :  { %366 = vmatpush.bf16.msrb.mxu1 %v684_v37 }
  0xd7   :  { %367 = vmatpush.bf16.msrb.mxu1 %v683_v38 }
  0xdb   :  { %368 = vmatpush.bf16.msrb.mxu1 %v682_v39 }
 0x13b   :  { %v189_v21 = vpop.f32.mrf.mxu1 }
 0x13c   :  { %v190_v23 = vadd.f32 %v707_v22, %v189_v21 }
 0x13e   :  { %v194_v26 = vmax.f32 %v190_v23, 0.0 }
 0x143   :  { %v191_v24 = vpop.f32.mrf.mxu1 }
 0x144   :  { %v192_v25 = vadd.f32 %v707_v22, %v191_v24 }
 0x146   :  { %v195_v27 = vmax.f32 %v192_v25, 0.0 }
 0x148   :  { %v196_v28 = vpack.c.bf16 %v195_v27, %v194_v26 }
 0x14a   :  { %270 = vmatmul.bf16.vlgmr.msra.gmra.mxu2 %v196_v28 }
 0x1cd   :  { %v271_v33 = vpop.f32.mrf.mxu2 }
 0x1d5   :  { %v273_v34 = vpop.f32.mrf.mxu2 }
 0x1d6   :  { %v276_v35 = vpack.c.bf16 %v273_v34, %v271_v33 }
 0x1d8   :  { %286 = vmatpush.bf16.msrb.mxu2 %v276_v35 }
 0x1db   :  { %597 = vmatmul.msk.bf16.vlgmr.msrb.gmra.mxu2 %vm176_vm0, %v893_v16 }
 0x25e   :  { %v288_v40 = vpop.f32.mrf.mxu2 }
 0x25f   :  { %v289_v42 = vadd.f32 %v708_v41, %v288_v40 }
 0x261   :  { %v293_v45 = vmax.f32 %v289_v42, 0.0 }
 0x266   :  { %v290_v43 = vpop.f32.mrf.mxu2 }
 0x267   :  { %v291_v44 = vadd.f32 %v708_v41, %v290_v43 }
 0x269   :  { %v294_v46 = vmax.f32 %v291_v44, 0.0 }
 0x26b   :  { %v295_v47 = vpack.c.bf16 %v294_v46, %v293_v45 }
 0x26d   :  { %369 = vmatmul.bf16.vlgmr.msrb.gmra.mxu1 %v295_v47 }
 0x2ea   :  { %v370_v48 = vpop.f32.mrf.mxu1 }
 0x2f2   :  { %v372_v49 = vpop.f32.mrf.mxu1 }
 0x2f3   :  { %v375_v51 = vpack.c.bf16 %v372_v49, %v370_v48 }
 0x2f5   :  { %385 = vmatpush.bf16.msra.mxu3 %v375_v51 }
 0x2f8   :  { %630 = vmatmul.msk.bf16.vlgmr.msra.gmra.mxu3 %vm176_vm0, %v893_v16 }
 0x2f9   :  { %460 = vmatpush.bf16.msrb.mxu3 %v697_v50 }
 0x2fd   :  { %461 = vmatpush.bf16.msrb.mxu3 %v696_v52 }
 0x301   :  { %462 = vmatpush.bf16.msrb.mxu3 %v695_v53 }
 0x305   :  { %463 = vmatpush.bf16.msrb.mxu3 %v694_v54 }
 0x309   :  { %464 = vmatpush.bf16.msrb.mxu3 %v693_v55 }
 0x30d   :  { %465 = vmatpush.bf16.msrb.mxu3 %v692_v56 }
 0x311   :  { %466 = vmatpush.bf16.msrb.mxu3 %v691_v57 }
 0x315   :  { %467 = vmatpush.bf16.msrb.mxu3 %v690_v58 }
 0x37b   :  { %v387_v59 = vpop.f32.mrf.mxu3 }
 0x37c   :  { %v388_v61 = vadd.f32 %v709_v60, %v387_v59 }
 0x37e   :  { %v392_v0 = vmax.f32 %v388_v61, 0.0 }
 0x383   :  { %v389_v62 = vpop.f32.mrf.mxu3 }
 0x384   :  { %v390_v63 = vadd.f32 %v709_v60, %v389_v62 }
 0x386   :  { %v393_v1 = vmax.f32 %v390_v63, 0.0 }
 0x388   :  { %v394_v2 = vpack.c.bf16 %v393_v1, %v392_v0 }
 0x38a   :  { %468 = vmatmul.bf16.vlgmr.msrb.gmra.mxu3 %v394_v2 }
 0x40d   :  { %v469_v3 = vpop.f32.mrf.mxu3 }
 0x415   :  { %v471_v4 = vpop.f32.mrf.mxu3 }
 0x416   :  { %v474_v5 = vpack.c.bf16 %v471_v4, %v469_v3 }
 0x418   :  { %484 = vmatpush.bf16.msrb.mxu0 %v474_v5 }
 0x41b   :  { %663 = vmatmul.msk.bf16.vlgmr.msrb.gmra.mxu0 %vm176_vm0, %v893_v16 }
 0x498   :  { %v486_v7 = vpop.f32.mrf.mxu0 }
 0x499   :  { %v487_v8 = vadd.f32 %v710_v6, %v486_v7 }
 0x49b   :  { %v491_v9 = vsub.f32 0.0, %v487_v8 }
 0x49d   :  { %v493_v10 = vmul.f32 1.442695, %v491_v9 }
 0x49f   :  { %711 = vpow2.f32 %v493_v10 }
 0x4a0   :  { %v488_v11 = vpop.f32.mrf.mxu0 }
 0x4a1   :  { %v489_v12 = vadd.f32 %v710_v6, %v488_v11 }
 0x4a3   :  { %v492_v13 = vsub.f32 0.0, %v489_v12 }
 0x4a5   :  { %v712_v14 = vpop.eup %711  ;;  %v495_v15 = vmul.f32 1.442695, %v492_v13 }
 0x4a6   :  { %v497_v17 = vadd.f32 1.0, %v712_v14 }
 0x4a7   :  { %713 = vpow2.f32 %v495_v15 }
 0x4a8   :  { %715 = vrcp.f32 %v497_v17 }
 0x4ad   :  { %v714_v18 = vpop.eup %713 }
 0x4ae   :  { %v716_v19 = vpop.eup %715  ;;  %v498_v20 = vadd.f32 1.0, %v714_v18 }
 0x4af   :  { %501 = vst [vmem:[#allocation10] sm:$0xff] %v716_v19 }
 0x4b0   :  { %717 = vrcp.f32 %v498_v20 }
 0x4b6   :  { %v718_v16 = vpop.eup %717 }
 0x4b7   :  { %502 = vst [vmem:[#allocation10 + $0x8] sm:$0xff] %v718_v16 }
 0x4b8   :  { %515 = dma.vmem_to_hbm [thread:$0]  %s508_s3, 256, %s510_s11, [#allocation4], %s854_s12, %s854_s12, %s855_s13  }
 0x4b9   :  { %845 = dma.done.wait [#allocation4], 256  }
 0x4ba   :  { %846 = vsyncadd [#allocation4], 4294967040 }
 0x4bb   :  { %520 = vsyncpa [#allocation3], 1 }
 0x4bc   :  { %521 = vsyncpa [#allocation6], 1 }
 0x4bd   :  { %522 = vsyncpa [#allocation9], 1 }
 0x4be   :  { %523 = vsyncpa [#allocation4], 1 }

</bundles_post_ra>
